<compile_context>
chip_gen: v7x
topology: tpu7x:2x2x1
jax: 0.10.0
libtpu: 0.0.40
codegen_flags: <defaults>
</compile_context>

<pallas_src>
import functools

import jax
import jax.numpy as jnp
from jax.experimental import pallas as pl
from jax.experimental.pallas import tpu as pltpu


def _round_up(x, m):
    return ((x + m - 1) // m) * m


# ---------------------------------------------------------------------------
# Kernel
# ---------------------------------------------------------------------------
def _classifier_kernel(n_hidden, *refs):
    """refs = (emb, mask3, w0, b0, ..., w_out, b_out, out, acc_scratch)."""
    emb_ref = refs[0]
    mask_ref = refs[1]
    param_refs = refs[2:2 + 2 * (n_hidden + 1)]
    out_ref = refs[2 + 2 * (n_hidden + 1)]
    acc_ref = refs[3 + 2 * (n_hidden + 1)]

    s_step = pl.program_id(1)
    s_last = pl.num_programs(1) - 1

    # --- init the running max at the first sequence step of each batch tile ---
    @pl.when(s_step == 0)
    def _():
        acc_ref[...] = jnp.full_like(acc_ref, -jnp.inf)

    # --- masked running max over this sequence chunk (f32 math on all chips) ---
    emb = emb_ref[...].astype(jnp.float32)                 # [TB, TS, E]
    msk = mask_ref[...].astype(jnp.float32)                # [TB, TS, 1]
    acc_ref[...] = jnp.maximum(acc_ref[...], jnp.max(emb * msk, axis=1))

    # --- MLP + lane-dense store only on the last sequence step ---------------
    @pl.when(s_step == s_last)
    def _():
        x = acc_ref[...]                                   # [TB, E] f32
        for i in range(n_hidden):
            w = param_refs[2 * i][...]                     # [in, out]
            b = param_refs[2 * i + 1][...].astype(jnp.float32)
            x = jnp.dot(x.astype(w.dtype), w,
                        preferred_element_type=jnp.float32) + b
            x = jnp.maximum(x, 0.0)                        # ReLU
        w_out = param_refs[-2][...]                        # [in, C_pad]
        b_out = param_refs[-1][...].astype(jnp.float32)    # [1, C_pad]
        y = jnp.dot(x.astype(w_out.dtype), w_out,
                    preferred_element_type=jnp.float32) + b_out
        out_ref[...] = y.astype(out_ref.dtype)             # [TB, C_pad], lane-dense


# ---------------------------------------------------------------------------
# Wrapper
# ---------------------------------------------------------------------------
_VMEM_LIMIT_BYTES = 40 * 1024 * 1024    # < v7x's 64 MiB physical, with headroom
_BLOCK_VMEM_BUDGET = 24 * 1024 * 1024   # budget for double-buffered blocks


def _pick_batch_tile(ts, e, c_pad, stream_bytes, weight_bytes,
                     budget=_BLOCK_VMEM_BUDGET):
    ts_pad = _round_up(ts, 8)
    e_pad = _round_up(e, 128)
    for tb in (1024, 512, 256, 128, 64, 32, 16, 8):
        need = (2 * tb * ts_pad * e_pad * stream_bytes     # emb (double-buffered)
                + 2 * tb * ts_pad * 128 * 4                # mask (lane-padded)
                + 2 * tb * c_pad * 4                       # output block
                + tb * e_pad * 4                           # running-max scratch
                + 2 * weight_bytes)                        # weights / biases
        if need <= budget:
            return tb
    return 8


def classifier_forward(embeddings, mask, params, *, stream_dtype=None,
                       batch_tile=None, seq_tile=None):
    """embeddings: [B, S, E]; mask: [B, S] (0/1); params: [(W[in,out], b[out]), ...]
    (hidden layers first, output layer last). Returns [B, n_classes] float32."""
    B, S, E = embeddings.shape
    n_hidden = len(params) - 1
    n_classes = params[-1][0].shape[1]
    c_pad = _round_up(n_classes, 128)          # lane-dense output store

    # ---- parameters: pad output layer to c_pad, optional narrow streaming ----
    ws = [w for w, _ in params]
    bs = [b for _, b in params]
    if c_pad != n_classes:
        ws[-1] = jnp.pad(ws[-1], ((0, 0), (0, c_pad - n_classes)))
        bs[-1] = jnp.pad(bs[-1], ((0, c_pad - n_classes),))
    if stream_dtype is not None:
        ws = [w.astype(stream_dtype) for w in ws]
    bs = [b.astype(jnp.float32).reshape(1, -1) for b in bs]

    stream_bytes = jnp.dtype(stream_dtype or embeddings.dtype).itemsize
    weight_bytes = sum(_round_up(w.shape[0], 8) * _round_up(w.shape[1], 128)
                       * w.dtype.itemsize for w in ws)
    weight_bytes += sum(8 * _round_up(b.shape[1], 128) * 4 for b in bs)

    # ---- tile sizes -----------------------------------------------------------
    if seq_tile is None:
        ts = S if S <= 128 else 128
    else:
        ts = max(8, min(int(seq_tile), S))
    if ts < S:
        ts = _round_up(ts, 8)                  # sublane-aligned sequence tiles
    s_pad = _round_up(S, ts)

    if batch_tile is None:
        tb = _pick_batch_tile(ts, E, c_pad, stream_bytes, weight_bytes)
    else:
        tb = _round_up(int(batch_tile), 8)
    tb = min(tb, _round_up(B, 8))
    b_pad = _round_up(B, tb)

    # ---- pad inputs -----------------------------------------------------------
    emb = embeddings
    msk = mask.astype(jnp.float32)
    if s_pad != S:
        # Padded sequence positions must never win the max: emb=-1e30, mask=1.
        emb = jnp.pad(emb, ((0, 0), (0, s_pad - S), (0, 0)), constant_values=-1e30)
        msk = jnp.pad(msk, ((0, 0), (0, s_pad - S)), constant_values=1.0)
    if b_pad != B:
        emb = jnp.pad(emb, ((0, b_pad - B), (0, 0), (0, 0)))
        msk = jnp.pad(msk, ((0, b_pad - B), (0, 0)))
    if stream_dtype is not None:
        emb = emb.astype(stream_dtype)
    mask3 = msk.reshape(b_pad, s_pad, 1)

    flat_params = []
    for w, b in zip(ws, bs):
        flat_params += [w, b]

    # ---- grid / specs ---------------------------------------------------------
    grid = (b_pad // tb, s_pad // ts)
    in_specs = [
        pl.BlockSpec((tb, ts, E), lambda bi, si: (bi, si, 0)),   # embeddings
        pl.BlockSpec((tb, ts, 1), lambda bi, si: (bi, si, 0)),   # mask
    ]
    for p in flat_params:                                        # weights / biases
        in_specs.append(pl.BlockSpec(p.shape, lambda bi, si: (0, 0)))
    out_spec = pl.BlockSpec((tb, c_pad), lambda bi, si: (bi, 0))  # revisited over si

    dims = [E] + [w.shape[1] for w in ws]
    flops = 2 * b_pad * s_pad * E                                 # mask mul + max
    flops += sum(2 * b_pad * dims[i] * dims[i + 1] for i in range(len(dims) - 1))
    bytes_accessed = (emb.size * emb.dtype.itemsize
                      + mask3.size * mask3.dtype.itemsize
                      + sum(p.size * p.dtype.itemsize for p in flat_params)
                      + b_pad * c_pad * 4)

    kernel = functools.partial(_classifier_kernel, n_hidden)
    out = pl.pallas_call(
        kernel,
        out_shape=jax.ShapeDtypeStruct((b_pad, c_pad), jnp.float32),
        grid_spec=pltpu.PrefetchScalarGridSpec(
            num_scalar_prefetch=0,
            grid=grid,
            in_specs=in_specs,
            out_specs=out_spec,
            scratch_shapes=[pltpu.VMEM((tb, E), jnp.float32)],
        ),
        compiler_params=pltpu.CompilerParams(
            dimension_semantics=("parallel", "arbitrary"),
            vmem_limit_bytes=_VMEM_LIMIT_BYTES,
        ),
        cost_estimate=pl.CostEstimate(flops=int(flops), transcendentals=0,
                                      bytes_accessed=int(bytes_accessed)),
    )(emb, mask3, *flat_params)

    return out[:B, :n_classes]


# ---------------------------------------------------------------------------
# Pure-JAX reference (same numerics as the kernel) + init
# ---------------------------------------------------------------------------
def classifier_reference(embeddings, mask, params, stream_dtype=None):
    ws = [w for w, _ in params]
    bs = [b for _, b in params]
    emb = embeddings
    if stream_dtype is not None:
        emb = emb.astype(stream_dtype)
        ws = [w.astype(stream_dtype) for w in ws]
    seq = emb.astype(jnp.float32) * mask.astype(jnp.float32)[..., None]
    x = jnp.max(seq, axis=1)
    for w, b in zip(ws[:-1], bs[:-1]):
        x = jnp.maximum(
            jnp.dot(x.astype(w.dtype), w, preferred_element_type=jnp.float32)
            + b.astype(jnp.float32), 0.0)
    return (jnp.dot(x.astype(ws[-1].dtype), ws[-1],
                    preferred_element_type=jnp.float32)
            + bs[-1].astype(jnp.float32))


def init_params(key, embedding_size, hidden_units, n_classes):
    """torch.nn.Linear-style init (uniform +/-1/sqrt(fan_in)); W stored [in, out]."""
    params = []
    prev = embedding_size
    for n_units in list(hidden_units) + [n_classes]:
        key, kw, kb = jax.random.split(key, 3)
        bound = 1.0 / (prev ** 0.5)
        w = jax.random.uniform(kw, (prev, n_units), jnp.float32, -bound, bound)
        b = jax.random.uniform(kb, (n_units,), jnp.float32, -bound, bound)
        params.append((w, b))
        prev = n_units
    return params


if __name__ == "__main__":
    root = jax.random.PRNGKey(0)

    # --- 1) small f32 run at the module's toy shapes ------------------------
    B, S, E = 2, 8, 32
    hidden_units = [32, 16]
    n_classes = 4
    k_emb, k_mask, k_param, root = jax.random.split(root, 4)
    embeddings = jax.random.normal(k_emb, (B, S, E), jnp.float32)
    mask = (jax.random.uniform(k_mask, (B, S)) > 0.3).astype(jnp.float32)
    params = init_params(k_param, E, hidden_units, n_classes)

    out = classifier_forward(embeddings, mask, params)
    jax.block_until_ready(out)
    ref = classifier_reference(embeddings, mask, params)
    assert out.shape == (B, n_classes)
    assert jnp.allclose(out, ref, atol=1e-4, rtol=1e-4), "f32 mismatch"

    # --- 2) bf16-streamed run exercising the (batch, seq) grid + padding ----
    B2, S2, E2 = 300, 15, 128
    hidden2 = [64, 32]
    classes2 = 10
    k_emb2, k_mask2, k_param2, root = jax.random.split(root, 4)
    emb2 = jax.random.normal(k_emb2, (B2, S2, E2), jnp.float32)
    mask2 = (jax.random.uniform(k_mask2, (B2, S2)) > 0.3).astype(jnp.float32)
    params2 = init_params(k_param2, E2, hidden2, classes2)

    out2 = classifier_forward(emb2, mask2, params2, stream_dtype=jnp.bfloat16,
                              batch_tile=128, seq_tile=8)
    jax.block_until_ready(out2)
    ref2 = classifier_reference(emb2, mask2, params2, stream_dtype=jnp.bfloat16)
    assert out2.shape == (B2, classes2)
    assert jnp.allclose(out2, ref2, atol=1e-2, rtol=1e-2), "bf16 mismatch"

    print("KERNEL_OK")
</pallas_src>

<mosaic_0001>
module attributes {stable_mosaic.version = 11 : i64} {
  func.func @_classifier_kernel(%arg0: i32, %arg1: i32, %arg2: memref<8x8x32xf32, #tpu.memory_space<vmem>>, %arg3: memref<8x8x1xf32, #tpu.memory_space<vmem>>, %arg4: memref<32x32xf32, #tpu.memory_space<vmem>>, %arg5: memref<1x32xf32, #tpu.memory_space<vmem>>, %arg6: memref<32x16xf32, #tpu.memory_space<vmem>>, %arg7: memref<1x16xf32, #tpu.memory_space<vmem>>, %arg8: memref<16x128xf32, #tpu.memory_space<vmem>>, %arg9: memref<1x128xf32, #tpu.memory_space<vmem>>, %arg10: memref<8x128xf32, #tpu.memory_space<vmem>>, %arg11: memref<8x32xf32, #tpu.memory_space<vmem>>) attributes {dimension_semantics = [#tpu.dimension_semantics<parallel>, #tpu.dimension_semantics<arbitrary>], iteration_bounds = array<i64: 1, 1>, scalar_prefetch = 0 : i64, scratch_operands = 1 : i64, tpu.core_type = #tpu.core_type<tc>, window_params = [{transform_indices = @transform_0, window_bounds = array<i64: 8, 8, 32>}, {transform_indices = @transform_1, window_bounds = array<i64: 8, 8, 1>}, {pipeline_mode = #tpu.pipeline_mode<synchronous>, transform_indices = @transform_2, window_bounds = array<i64: 32, 32>}, {pipeline_mode = #tpu.pipeline_mode<synchronous>, transform_indices = @transform_3, window_bounds = array<i64: 1, 32>}, {pipeline_mode = #tpu.pipeline_mode<synchronous>, transform_indices = @transform_4, window_bounds = array<i64: 32, 16>}, {pipeline_mode = #tpu.pipeline_mode<synchronous>, transform_indices = @transform_5, window_bounds = array<i64: 1, 16>}, {pipeline_mode = #tpu.pipeline_mode<synchronous>, transform_indices = @transform_6, window_bounds = array<i64: 16, 128>}, {pipeline_mode = #tpu.pipeline_mode<synchronous>, transform_indices = @transform_7, window_bounds = array<i64: 1, 128>}, {transform_indices = @transform_8, window_bounds = array<i64: 8, 128>}]} {
    %c0_i32 = arith.constant 0 : i32
    %0 = arith.cmpi eq, %arg1, %c0_i32 : i32
    %1 = arith.extui %0 : i1 to i32
    %c0_i32_0 = arith.constant 0 : i32
    %2 = arith.cmpi ne, %1, %c0_i32_0 : i32
    scf.if %2 {
      %cst_12 = arith.constant 0xFF800000 : f32
      %14 = vector.broadcast %cst_12 : f32 to vector<8x32xf32>
      %c0_13 = arith.constant 0 : index
      %c0_14 = arith.constant 0 : index
      %15 = vector.load %arg11[%c0_13, %c0_14] : memref<8x32xf32, #tpu.memory_space<vmem>>, vector<8x32xf32>
      tpu.vector_store %arg11[%c0_13, %c0_14], %14 {strides = array<i32>} : memref<8x32xf32, #tpu.memory_space<vmem>>, vector<8x32xf32>,
    } else {
    }
    %c0 = arith.constant 0 : index
    %c0_1 = arith.constant 0 : index
    %c0_2 = arith.constant 0 : index
    %3 = vector.load %arg2[%c0, %c0_1, %c0_2] : memref<8x8x32xf32, #tpu.memory_space<vmem>>, vector<8x8x32xf32>
    %c0_3 = arith.constant 0 : index
    %c0_4 = arith.constant 0 : index
    %c0_5 = arith.constant 0 : index
    %4 = vector.load %arg3[%c0_3, %c0_4, %c0_5] : memref<8x8x1xf32, #tpu.memory_space<vmem>>, vector<8x8x1xf32>
    %c0_6 = arith.constant 0 : index
    %c0_7 = arith.constant 0 : index
    %5 = vector.load %arg11[%c0_6, %c0_7] : memref<8x32xf32, #tpu.memory_space<vmem>>, vector<8x32xf32>
    %6 = vector.broadcast %4 : vector<8x8x1xf32> to vector<8x8x32xf32>
    %7 = arith.mulf %3, %6 : vector<8x8x32xf32>
    %cst = arith.constant dense<0xFF800000> : vector<8x32xf32>
    %8 = vector.multi_reduction <maximumf>, %7, %cst [1] : vector<8x8x32xf32> to vector<8x32xf32>
    %9 = arith.maximumf %5, %8 : vector<8x32xf32>
    %c0_8 = arith.constant 0 : index
    %c0_9 = arith.constant 0 : index
    %10 = vector.load %arg11[%c0_8, %c0_9] : memref<8x32xf32, #tpu.memory_space<vmem>>, vector<8x32xf32>
    tpu.vector_store %arg11[%c0_8, %c0_9], %9 {strides = array<i32>} : memref<8x32xf32, #tpu.memory_space<vmem>>, vector<8x32xf32>,
    %c0_i32_10 = arith.constant 0 : i32
    %11 = arith.cmpi eq, %arg1, %c0_i32_10 : i32
    %12 = arith.extui %11 : i1 to i32
    %c0_i32_11 = arith.constant 0 : i32
    %13 = arith.cmpi ne, %12, %c0_i32_11 : i32
    scf.if %13 {
      %c0_12 = arith.constant 0 : index
      %c0_13 = arith.constant 0 : index
      %14 = vector.load %arg11[%c0_12, %c0_13] : memref<8x32xf32, #tpu.memory_space<vmem>>, vector<8x32xf32>
      %c0_14 = arith.constant 0 : index
      %c0_15 = arith.constant 0 : index
      %15 = vector.load %arg4[%c0_14, %c0_15] : memref<32x32xf32, #tpu.memory_space<vmem>>, vector<32x32xf32>
      %c0_16 = arith.constant 0 : index
      %c0_17 = arith.constant 0 : index
      %16 = vector.load %arg5[%c0_16, %c0_17] : memref<1x32xf32, #tpu.memory_space<vmem>>, vector<1x32xf32>
      %cst_18 = arith.constant dense<0.000000e+00> : vector<8x32xf32>
      %17 = tpu.matmul %14, %15, %cst_18 {dimension_numbers = #tpu.dot_dimension_numbers<[1], [0], [0], [1], [0, 0, 1, 1], [], []>} : vector<8x32xf32>, vector<32x32xf32>, vector<8x32xf32> -> vector<8x32xf32>
      %18 = vector.broadcast %16 : vector<1x32xf32> to vector<8x32xf32>
      %19 = arith.addf %17, %18 : vector<8x32xf32>
      %cst_19 = arith.constant 0.000000e+00 : f32
      %20 = vector.broadcast %cst_19 : f32 to vector<8x32xf32>
      %21 = arith.maximumf %19, %20 : vector<8x32xf32>
      %c0_20 = arith.constant 0 : index
      %c0_21 = arith.constant 0 : index
      %22 = vector.load %arg6[%c0_20, %c0_21] : memref<32x16xf32, #tpu.memory_space<vmem>>, vector<32x16xf32>
      %c0_22 = arith.constant 0 : index
      %c0_23 = arith.constant 0 : index
      %23 = vector.load %arg7[%c0_22, %c0_23] : memref<1x16xf32, #tpu.memory_space<vmem>>, vector<1x16xf32>
      %cst_24 = arith.constant dense<0.000000e+00> : vector<8x16xf32>
      %24 = tpu.matmul %21, %22, %cst_24 {dimension_numbers = #tpu.dot_dimension_numbers<[1], [0], [0], [1], [0, 0, 1, 1], [], []>} : vector<8x32xf32>, vector<32x16xf32>, vector<8x16xf32> -> vector<8x16xf32>
      %25 = vector.broadcast %23 : vector<1x16xf32> to vector<8x16xf32>
      %26 = arith.addf %24, %25 : vector<8x16xf32>
      %cst_25 = arith.constant 0.000000e+00 : f32
      %27 = vector.broadcast %cst_25 : f32 to vector<8x16xf32>
      %28 = arith.maximumf %26, %27 : vector<8x16xf32>
      %c0_26 = arith.constant 0 : index
      %c0_27 = arith.constant 0 : index
      %29 = vector.load %arg8[%c0_26, %c0_27] : memref<16x128xf32, #tpu.memory_space<vmem>>, vector<16x128xf32>
      %c0_28 = arith.constant 0 : index
      %c0_29 = arith.constant 0 : index
      %30 = vector.load %arg9[%c0_28, %c0_29] : memref<1x128xf32, #tpu.memory_space<vmem>>, vector<1x128xf32>
      %cst_30 = arith.constant dense<0.000000e+00> : vector<8x128xf32>
      %31 = tpu.matmul %28, %29, %cst_30 {dimension_numbers = #tpu.dot_dimension_numbers<[1], [0], [0], [1], [0, 0, 1, 1], [], []>} : vector<8x16xf32>, vector<16x128xf32>, vector<8x128xf32> -> vector<8x128xf32>
      %32 = vector.broadcast %30 : vector<1x128xf32> to vector<8x128xf32>
      %33 = arith.addf %31, %32 : vector<8x128xf32>
      %c0_31 = arith.constant 0 : index
      %c0_32 = arith.constant 0 : index
      %34 = vector.load %arg10[%c0_31, %c0_32] : memref<8x128xf32, #tpu.memory_space<vmem>>, vector<8x128xf32>
      tpu.vector_store %arg10[%c0_31, %c0_32], %33 {strides = array<i32>} : memref<8x128xf32, #tpu.memory_space<vmem>>, vector<8x128xf32>,
    } else {
    }
    return
  }
  func.func @transform_0(%arg0: i32, %arg1: i32) -> (i32, i32, i32) {
    %c0_i32 = arith.constant 0 : i32
    %c0_i32_0 = arith.constant 0 : i32
    return %arg0, %arg1, %c0_i32 : i32, i32, i32
  }
  func.func @transform_1(%arg0: i32, %arg1: i32) -> (i32, i32, i32) {
    %c0_i32 = arith.constant 0 : i32
    %c0_i32_0 = arith.constant 0 : i32
    return %arg0, %arg1, %c0_i32 : i32, i32, i32
  }
  func.func @transform_2(%arg0: i32, %arg1: i32) -> (i32, i32) {
    %c0_i32 = arith.constant 0 : i32
    %c0_i32_0 = arith.constant 0 : i32
    %c0_i32_1 = arith.constant 0 : i32
    return %c0_i32, %c0_i32_0 : i32, i32
  }
  func.func @transform_3(%arg0: i32, %arg1: i32) -> (i32, i32) {
    %c0_i32 = arith.constant 0 : i32
    %c0_i32_0 = arith.constant 0 : i32
    %c0_i32_1 = arith.constant 0 : i32
    return %c0_i32, %c0_i32_0 : i32, i32
  }
  func.func @transform_4(%arg0: i32, %arg1: i32) -> (i32, i32) {
    %c0_i32 = arith.constant 0 : i32
    %c0_i32_0 = arith.constant 0 : i32
    %c0_i32_1 = arith.constant 0 : i32
    return %c0_i32, %c0_i32_0 : i32, i32
  }
  func.func @transform_5(%arg0: i32, %arg1: i32) -> (i32, i32) {
    %c0_i32 = arith.constant 0 : i32
    %c0_i32_0 = arith.constant 0 : i32
    %c0_i32_1 = arith.constant 0 : i32
    return %c0_i32, %c0_i32_0 : i32, i32
  }
  func.func @transform_6(%arg0: i32, %arg1: i32) -> (i32, i32) {
    %c0_i32 = arith.constant 0 : i32
    %c0_i32_0 = arith.constant 0 : i32
    %c0_i32_1 = arith.constant 0 : i32
    return %c0_i32, %c0_i32_0 : i32, i32
  }
  func.func @transform_7(%arg0: i32, %arg1: i32) -> (i32, i32) {
    %c0_i32 = arith.constant 0 : i32
    %c0_i32_0 = arith.constant 0 : i32
    %c0_i32_1 = arith.constant 0 : i32
    return %c0_i32, %c0_i32_0 : i32, i32
  }
  func.func @transform_8(%arg0: i32, %arg1: i32) -> (i32, i32) {
    %c0_i32 = arith.constant 0 : i32
    %c0_i32_0 = arith.constant 0 : i32
    return %arg0, %c0_i32 : i32, i32
  }
}

</mosaic_0001>

<bundles_post_ra>
// kernel: tpu_custom_call.1
= control target key start
LH: loop header
LB: loop body
LE: loop exit
PB: predicated region body
PF: predicated region fallthrough
CT: control target
= control target key end

     0   :  { %v550_v2 = vmov 0   ;;  %s718_s0 = inlined_call_operand.vmem [shape: f32[8,8,32], index: 0, kind: input, shape index: {}]   ;;  %s719_s1 = inlined_call_operand.vmem [shape: f32[8,8,1], index: 1, kind: input, shape index: {}]   ;;  %s720_s2 = inlined_call_operand.vmem [shape: f32[32,32], index: 2, kind: input, shape index: {}]   ;;  %s721_s3 = inlined_call_operand.vmem [shape: f32[1,32], index: 3, kind: input, shape index: {}]   ;;  %s722_s4 = inlined_call_operand.vmem [shape: f32[32,16], index: 4, kind: input, shape index: {}]   ;;  %s723_s5 = inlined_call_operand.vmem [shape: f32[1,16], index: 5, kind: input, shape index: {}]   ;;  %s724_s6 = inlined_call_operand.vmem [shape: f32[16,128], index: 6, kind: input, shape index: {}]   ;;  %s725_s7 = inlined_call_operand.vmem [shape: f32[1,128], index: 7, kind: input, shape index: {}]   ;;  %s726_s8 = inlined_call_operand.hbm [shape: f32[8,128], index: 8, kind: output, shape index: {}]  }
   0x1   :  { %v46_v0 = vld [vmem:[%s719_s1 + $0x10] sm:$0xff]  ;;  %v44_v1 = vld [vmem:[%s719_s1] sm:$0xff]  ;;  %525 = vset.pattern.permute.xlu1 %v550_v2  ;;  %524 = vset.pattern.permute.xlu0 %v550_v2  ;;  %v47_v3 = vld [vmem:[%s719_s1 + $0x18] sm:$0xff] }
   0x2   :  { %65 = vperm.xlu1 %525, %v46_v0   ;;  %55 = vperm.xlu0 %524, %v44_v1   ;;  %v45_v4 = vld [vmem:[%s719_s1 + $0x8] sm:$0xff] }
   0x3   :  { %13 = vsyncpa [#allocation4], 0  ;;  %v49_v5 = vld [vmem:[%s719_s1 + $0x28] sm:$0xff]  ;;  %v48_v6 = vld [vmem:[%s719_s1 + $0x20] sm:$0xff]  ;;  %vm34_vm0 = vcmask 261120   ;;  %v551_v9 = vmov -inf  }
   0x4   :  { %v51_v7 = vld [vmem:[%s719_s1 + $0x38] sm:$0xff]  ;;  %v50_v8 = vld [vmem:[%s719_s1 + $0x30] sm:$0xff]  ;;  %35 = vst.msk [vmem:[#allocation2] sm:$0xff] %vm34_vm0, %v551_v9  ;;  %v187_v10 = vld [vmem:[%s720_s2] sm:$0xff]  ;;  %v552_v15 = vmov 0.0|0.0   ;;  %vm553_vm1 = vmmov 0  }
   0x5   :  { %v188_v11 = vld [vmem:[%s720_s2 + $0x8] sm:$0xff]  ;;  %v189_v13 = vld [vmem:[%s720_s2 + $0x10] sm:$0xff]  ;;  %v190_v14 = vld [vmem:[%s720_s2 + $0x18] sm:$0xff]  ;;  %503 = vmatprep.subr.bf16.mxu0 %v552_v15  ;;  %v554_v16 = vmov 0.0   ;;  %509 = vmatprep.subr.bf16.mxu1 %v552_v15  ;;  %vm166_vm2 = vcmask 1041409   ;;  %vm168_vm3 = vcmask 1042434  }
   0x6   :  { %70 = vperm.xlu1 %525, %v47_v3   ;;  %60 = vperm.xlu0 %524, %v45_v4   ;;  %v504_v12 = vpack.c.bf16 %v188_v11, %v187_v10  ;;  %v507_v17 = vpack.c.bf16 %v190_v14, %v189_v13  ;;  %v272_v18 = vld [vmem:[%s722_s4] sm:$0xff]  ;;  %v273_v19 = vld [vmem:[%s722_s4 + $0x8] sm:$0xff]  ;;  %v38_v21 = vld [vmem:[%s718_s0 + $0x10] sm:$0xff]  ;;  %vm170_vm4 = vcmask 1043459   ;;  %vm172_vm5 = vcmask 1044484   ;;  %s555_s12 = smov [#allocation3]  }
   0x7   :  { %482 = vmatprep.mubr.msk.f32.mxu0 %vm553_vm1, %v554_v16  ;;  %493 = vmatprep.mubr.msk.f32.mxu1 %vm553_vm1, %v554_v16  ;;  %v510_v20 = vpack.c.bf16 %v273_v19, %v272_v18  ;;  %v36_v22 = vld [vmem:[%s718_s0] sm:$0xff]  ;;  %v39_v27 = vld [vmem:[%s718_s0 + $0x18] sm:$0xff]  ;;  %v37_v28 = vld [vmem:[%s718_s0 + $0x8] sm:$0xff]  ;;  %vm174_vm6 = vcmask 1045509   ;;  %vm176_vm7 = vcmask 1046534   ;;  %vm178_vm8 = vcmask 1047559  }
   0x8   :  { %505 = vmatpush3.bf16.msra.mxu0 %v504_v12  ;;  %v41_v39 = vld [vmem:[%s718_s0 + $0x28] sm:$0xff]  ;;  %v40_v40 = vld [vmem:[%s718_s0 + $0x20] sm:$0xff]  ;;  %v43_v55 = vld [vmem:[%s718_s0 + $0x38] sm:$0xff]  ;;  %vm366_vm9 = vcmask 130048   ;;  %s447_s13 = sshll.u32 %s555_s12, 4  ;;  %s448_s13 = int_to_ptr.vmem [resolvable:$true] %s447_s13 }
   0x9   :  { %506 = vmatprep.subr.bf16.mxu0 %v552_v15  ;;  %511 = vmatpush3.bf16.msra.mxu1 %v510_v20  ;;  %v42_v56 = vld [vmem:[%s718_s0 + $0x30] sm:$0xff]  ;;  %p531_p1 = scmp.lt.s32.totalorder %s448_s13, %s448_s13 }
   0xa   :  { %80 = vperm.xlu1 %525, %v49_v5   ;;  %75 = vperm.xlu0 %524, %v48_v6  }
   0xb   :  { %512 = vmatprep.subr.bf16.mxu1 %v552_v15 }
   0xc   :  { %508 = vmatpush3.bf16.msra.mxu0 %v507_v17 }
   0xd   :  { %515 = vmatprep.subr.bf16.mxu0 %v552_v15 }
   0xe   :  { %90 = vperm.xlu1 %525, %v51_v7   ;;  %85 = vperm.xlu0 %524, %v50_v8  }
  0x81   :  { %v66_v23 = vpop.permute.xlu1 %65  ;;  %v56_v24 = vpop.permute.xlu0 %55 }
  0x82   :  { %v95_v25 = vmul.f32 %v66_v23, %v38_v21  ;;  %v93_v26 = vmul.f32 %v56_v24, %v36_v22 }
  0x84   :  { %v116_v29 = vsel %vm34_vm0, %v95_v25, -inf  ;;  %v102_v30 = vsel %vm34_vm0, %v93_v26, -inf }
  0x85   :  { %v117_v31 = vrot.slane %v116_v29, 4  ;;  %v103_v32 = vrot.slane %v102_v30, 4  ;;  %v71_v33 = vpop.permute.xlu1 %70  ;;  %v61_v34 = vpop.permute.xlu0 %60 }
  0x86   :  { %v96_v35 = vmul.f32 %v71_v33, %v39_v27  ;;  %v94_v36 = vmul.f32 %v61_v34, %v37_v28 }
  0x87   :  { %v118_v37 = vmax.f32 %v116_v29, %v117_v31  ;;  %v104_v38 = vmax.f32 %v102_v30, %v103_v32 }
  0x88   :  { %v123_v41 = vsel %vm34_vm0, %v96_v35, -inf  ;;  %v109_v42 = vsel %vm34_vm0, %v94_v36, -inf }
  0x89   :  { %v119_v43 = vrot.slane %v118_v37, 2  ;;  %v105_v44 = vrot.slane %v104_v38, 2  ;;  %v124_v45 = vrot.slane %v123_v41, 4  ;;  %v110_v46 = vrot.slane %v109_v42, 4  ;;  %v81_v47 = vpop.permute.xlu1 %80  ;;  %v76_v48 = vpop.permute.xlu0 %75 }
  0x8a   :  { %v98_v49 = vmul.f32 %v81_v47, %v41_v39  ;;  %v97_v50 = vmul.f32 %v76_v48, %v40_v40  ;;  %v274_v48 = vld [vmem:[%s722_s4 + $0x10] sm:$0xff] }
  0x8b   :  { %v120_v51 = vmax.f32 %v118_v37, %v119_v43  ;;  %v106_v52 = vmax.f32 %v104_v38, %v105_v44  ;;  %v125_v53 = vmax.f32 %v123_v41, %v124_v45  ;;  %v111_v54 = vmax.f32 %v109_v42, %v110_v46  ;;  %v52_v42 = vld [vmem:[#allocation2] sm:$0xff] }
  0x8c   :  { %v137_v57 = vsel %vm34_vm0, %v98_v49, -inf  ;;  %v130_v58 = vsel %vm34_vm0, %v97_v50, -inf  ;;  %v275_v49 = vld [vmem:[%s722_s4 + $0x18] sm:$0xff] }
  0x8d   :  { %v126_v59 = vrot.slane %v125_v53, 2  ;;  %v112_v60 = vrot.slane %v111_v54, 2  ;;  %v91_v61 = vpop.permute.xlu1 %90  ;;  %v86_v62 = vpop.permute.xlu0 %85  ;;  %v138_v63 = vrot.slane %v137_v57, 4  ;;  %v131_v0 = vrot.slane %v130_v58, 4 }
  0x8e   :  { %v100_v1 = vmul.f32 %v91_v61, %v43_v55  ;;  %v99_v2 = vmul.f32 %v86_v62, %v42_v56  ;;  %v121_v3 = vrot.slane %v120_v51, 1  ;;  %v107_v4 = vrot.slane %v106_v52, 1  ;;  %v358_v56 = vld [vmem:[%s724_s6 + $0x8] sm:$0xff] }
  0x8f   :  { %v127_v5 = vmax.f32 %v125_v53, %v126_v59  ;;  %v113_v6 = vmax.f32 %v111_v54, %v112_v60  ;;  %v139_v7 = vmax.f32 %v137_v57, %v138_v63  ;;  %v132_v8 = vmax.f32 %v130_v58, %v131_v0  ;;  %v457_v58 = vld [vmem:[%s723_s5] ss:$0 sm:$0xff] }
  0x90   :  { %v151_v9 = vsel %vm34_vm0, %v100_v1, -inf  ;;  %v144_v10 = vsel %vm34_vm0, %v99_v2, -inf  ;;  %v108_v18 = vmax.f32 %v106_v52, %v107_v4  ;;  %v122_v22 = vmax.f32 %v120_v51, %v121_v3  ;;  %v455_v51 = vld [vmem:[%s721_s3] ss:$0 sm:$0xff] }
  0x91   :  { %v128_v11 = vrot.slane %v127_v5, 1  ;;  %v114_v12 = vrot.slane %v113_v6, 1  ;;  %v152_v13 = vrot.slane %v151_v9, 4  ;;  %v145_v14 = vrot.slane %v144_v10, 4  ;;  %v459_v63 = vld [vmem:[%s725_s7] ss:$0 sm:$0xff] }
  0x92   :  { %v140_v15 = vrot.slane %v139_v7, 2  ;;  %v133_v17 = vrot.slane %v132_v8, 2  ;;  %v513_v50 = vpack.c.bf16 %v275_v49, %v274_v48 }
  0x93   :  { %v115_v19 = vmax.f32 %v113_v6, %v114_v12  ;;  %v153_v20 = vmax.f32 %v151_v9, %v152_v13  ;;  %v146_v21 = vmax.f32 %v144_v10, %v145_v14  ;;  %v129_v25 = vmax.f32 %v127_v5, %v128_v11 }
  0x94   :  { %v141_v23 = vmax.f32 %v139_v7, %v140_v15  ;;  %v134_v24 = vmax.f32 %v132_v8, %v133_v17  ;;  %514 = vmatpush3.bf16.msra.mxu1 %v513_v50 }
  0x95   :  { %v167_v26 = vsel %vm166_vm2, %v115_v19, %v108_v18  ;;  %v154_v27 = vrot.slane %v153_v20, 2  ;;  %v147_v28 = vrot.slane %v146_v21, 2 }
  0x96   :  { %v169_v29 = vsel %vm168_vm3, %v122_v22, %v167_v26  ;;  %v142_v30 = vrot.slane %v141_v23, 1  ;;  %v135_v31 = vrot.slane %v134_v24, 1 }
  0x97   :  { %v171_v32 = vsel %vm170_vm4, %v129_v25, %v169_v29  ;;  %v155_v33 = vmax.f32 %v153_v20, %v154_v27  ;;  %v148_v34 = vmax.f32 %v146_v21, %v147_v28 }
  0x98   :  { %v143_v35 = vmax.f32 %v141_v23, %v142_v30  ;;  %v136_v36 = vmax.f32 %v134_v24, %v135_v31 }
  0x99   :  { %v156_v37 = vrot.slane %v155_v33, 1  ;;  %v149_v38 = vrot.slane %v148_v34, 1 }
  0x9a   :  { %v173_v39 = vsel %vm172_vm5, %v136_v36, %v171_v32 }
  0x9b   :  { %v157_v40 = vmax.f32 %v155_v33, %v156_v37  ;;  %v150_v41 = vmax.f32 %v148_v34, %v149_v38  ;;  %v175_v43 = vsel %vm174_vm6, %v143_v35, %v173_v39 }
  0x9d   :  { %v177_v44 = vsel %vm176_vm7, %v150_v41, %v175_v43 }
  0x9e   :  { %v179_v45 = vsel %vm178_vm8, %v157_v40, %v177_v44 }
  0x9f   :  { %v181_v46 = vmax.f32 %v52_v42, %v179_v45 }
  0xa1   :  { %182 = vst.msk [vmem:[#allocation2] sm:$0xff] %vm34_vm0, %v181_v46 }
  0xa8   :  { %v186_v47 = vld [vmem:[#allocation2] sm:$0xff] }
  0xa9   :  { %483 = vmatmul.mubr.msk.f32.vlgmr.msra.gmra.mrb[0].mxu0 %vm34_vm0, %v186_v47 }
  0xaa   :  { %500 = vmatprep.mubr.msk.f32.mxu0 %vm553_vm1, %v554_v16  ;;  %v357_v16 = vld [vmem:[%s724_s6] sm:$0xff]  ;;  %s526_s6 = scalar_lea.vmem %s448_s13, 128 }
  0xab   :  { %v516_v57 = vpack.c.bf16 %v358_v56, %v357_v16  ;;  %p527_p0 = scmp.ne.s32.totalorder %s448_s13, %s526_s6  ;;  %p532_p2 = scmp.lt.s32.totalorder %s526_s6, %s526_s6 }
  0xad   :  { %517 = vmatpush3.bf16.msra.mxu0 %v516_v57  ;;  %p533_p3 = por %p532_p2, %p531_p1 }
  0xaf   :  { %p534_p4 = pnand %p533_p3, %p527_p0 }
 0x17c   :  { %v267_v52 = vpop.f32.mrb[0].mxu0 }
 0x17d   :  { %v268_v53 = vadd.f32 %v455_v51, %v267_v52  ;;  %v484_v54 = vpop.f32.mrb[1].mxu0 }
 0x17f   :  { %v271_v55 = vmax.f32 %v268_v53, 0.0 }
 0x181   :  { %494 = vmatmul.mubr.msk.f32.vlgmr.msra.gmra.mrb[0].mxu1 %vm34_vm0, %v271_v55 }
 0x254   :  { %v352_v59 = vpop.f32.mrb[0].mxu1 }
 0x255   :  { %v353_v60 = vadd.f32 %v457_v58, %v352_v59  ;;  %v495_v61 = vpop.f32.mrb[1].mxu1 }
 0x257   :  { %v356_v62 = vmax.f32 %v353_v60, 0.0 }
 0x259   :  { %501 = vmatmul.mubr.msk.f32.vlgmr.msra.gmra.mrb[2].mxu0 %vm366_vm9, %v356_v62 }
 0x32c   :  { %v436_v0 = vpop.f32.mrb[2].mxu0 }
 0x32d   :  { %v437_v1 = vadd.f32 %v459_v63, %v436_v0  ;;  %v502_v2 = vpop.f32.mrb[3].mxu0 }
 0x32f   :  { %440 = vst [vmem:[#allocation3] sm:$0xff] %v437_v1 }
 0x330   :  { %537 = shalt.err (!%p534_p4)
}
 0x331   :  { %s538_s15 = scalar_lea.hbm %s726_s8, 128 }
 0x332   :  { %p539_p5 = scmp.ne.s32.totalorder %s726_s8, %s538_s15  ;;  %p542_p6 = scmp.lt.u32.totalorder %s538_s15, %s726_s8 }
 0x334   :  { %p544_p7 = pnand %p542_p6, %p539_p5 }
 0x336   :  { %547 = shalt.err (!%p544_p7)
}
 0x337   :  { %450 = dma.vmem_to_hbm [thread:$0]  %s448_s13, 128, %s726_s8, [#allocation4]  }
 0x338   :  { %548 = dma.done.wait [#allocation4], 128  }
 0x339   :  { %549 = vsyncadd [#allocation4], 4294967168 }
 0x33a   :  { %454 = vsyncpa [#allocation4], 1 }

</bundles_post_ra>
